<compile_context>
chip_gen: v5e
topology: v5e:2x2
jax: 0.10.0
libtpu: 0.0.40
codegen_flags: <defaults>
</compile_context>

<pallas_src>
import jax
import jax.numpy as jnp
from jax import lax
from jax.experimental import pallas as pl
from jax.experimental.pallas import tpu as pltpu


def _round_up(x, m):
    return (x + m - 1) // m * m


def _make_embed_ln_kernel(has_proj, has_mask, eps):
    """Fused: pre-summed stream -> [optional proj matmul] -> LayerNorm [-> *mask].

    Ref order: (x_ref, [w_ref], gamma_ref, beta_ref, [mask_ref], out_ref)
    """

    def kernel(*refs):
        idx = 0
        x_ref = refs[idx]; idx += 1
        x = x_ref[...]

        if has_proj:
            w_ref = refs[idx]; idx += 1
            # MXU matmul: native-dtype operands, f32 accumulation.
            h = jnp.dot(x, w_ref[...], preferred_element_type=jnp.float32)
        else:
            h = x.astype(jnp.float32)

        gamma_ref = refs[idx]; idx += 1
        beta_ref = refs[idx]; idx += 1
        if has_mask:
            mask_ref = refs[idx]; idx += 1
        out_ref = refs[idx]

        # LayerNorm epilogue in f32.  Two independent lane reductions
        # (E[x], E[x^2]) so both XLU reduces can overlap VPU work, and
        # var = E[x^2] - mean^2 avoids the centered full-tile temp.
        inv_h = 1.0 / float(h.shape[-1])
        mean = jnp.sum(h, axis=-1, keepdims=True) * inv_h
        mean_sq = jnp.sum(h * h, axis=-1, keepdims=True) * inv_h
        var = mean_sq - mean * mean
        y = (h - mean) * lax.rsqrt(var + eps)
        y = y * gamma_ref[...].astype(jnp.float32) + beta_ref[...].astype(jnp.float32)
        if has_mask:
            # MaskedLayerNorm: zero out padded positions.
            y = y * mask_ref[...].astype(jnp.float32)
        out_ref[...] = y.astype(out_ref.dtype)

    return kernel


def bert_embeddings(
    input_ids,                 # [B, S] int
    word_table,                # [vocab, E]
    position_table,            # [max_pos, E]
    token_type_table=None,     # [type_vocab, E] or None (type_vocab_size == 0)
    embed_proj_weight_t=None,  # [E, H] pre-transposed nn.Linear weight, or None
    ln_gamma=None,             # [H]
    ln_beta=None,              # [H]
    ln_eps=1e-7,
    token_type_ids=None,       # [B, S] int or None
    position_ids=None,         # [B, S] int or None
    mask=None,                 # [B, S] (0/1) or None
    position_biased_input=True,
    *,
    tm=512,                    # row tile (sweet spot for mem-bound kernels)
    out_dtype=None,            # defaults to word_table.dtype; use bf16 in prod
):
    B, S = input_ids.shape
    E = word_table.shape[1]
    H = embed_proj_weight_t.shape[1] if embed_proj_weight_t is not None else E
    M = B * S
    out_dtype = word_table.dtype if out_dtype is None else out_dtype

    if position_ids is None:
        position_ids = jnp.broadcast_to(
            jnp.arange(S, dtype=jnp.int32)[None, :], (B, S))
    if token_type_ids is None:
        token_type_ids = jnp.zeros_like(input_ids)

    # Row tile: multiple of 16 sublanes, clamped so the grid has >=2 steps
    # where possible (v7x has 2 TensorCores sharded across the parallel axis).
    # Pad ragged M instead of asserting divisibility.
    m16 = _round_up(M, 16)
    tm_eff = min(tm, max(16, _round_up((m16 + 1) // 2, 16)))
    tm_eff = _round_up(tm_eff, 16)
    m_pad = _round_up(M, tm_eff)

    ids_flat = input_ids.reshape(M).astype(jnp.int32)
    pos_flat = position_ids.reshape(M).astype(jnp.int32)

    # Irregular HBM gathers stay in XLA; the streams are summed HERE so only a
    # single [M, E] array is re-read by the kernel (XLA fuses gathers + adds).
    position_embeddings = jnp.take(position_table, pos_flat, axis=0)
    x_sum = jnp.take(word_table, ids_flat, axis=0)
    if token_type_table is not None:
        tt_flat = token_type_ids.reshape(M).astype(jnp.int32)
        x_sum = x_sum + jnp.take(token_type_table, tt_flat, axis=0)
    if position_biased_input:
        x_sum = x_sum + position_embeddings
    if m_pad != M:
        x_sum = jnp.pad(x_sum, ((0, m_pad - M), (0, 0)))

    has_proj = embed_proj_weight_t is not None
    has_mask = mask is not None
    kernel = _make_embed_ln_kernel(has_proj, has_mask, float(ln_eps))

    in_specs = [pl.BlockSpec((tm_eff, E), lambda i: (i, 0))]
    inputs = [x_sum]
    if has_proj:
        # Full [E, H] weight resident across the row grid (DMA'd once/call).
        # Scaling note: if E*H outgrows VMEM, tile the contraction axis E with
        # a (tm, H) f32 accumulator and finish LN under pl.when(k == last);
        # never tile H (LayerNorm needs the whole row for mean/var).
        in_specs.append(pl.BlockSpec((E, H), lambda i: (0, 0)))
        inputs.append(embed_proj_weight_t)
    in_specs += [
        pl.BlockSpec((1, H), lambda i: (0, 0)),        # gamma
        pl.BlockSpec((1, H), lambda i: (0, 0)),        # beta
    ]
    inputs += [ln_gamma.reshape(1, H), ln_beta.reshape(1, H)]
    if has_mask:
        mask_flat = mask.reshape(M).astype(jnp.float32)
        if m_pad != M:
            mask_flat = jnp.pad(mask_flat, (0, m_pad - M))
        in_specs.append(pl.BlockSpec((tm_eff, 1), lambda i: (i, 0)))
        inputs.append(mask_flat.reshape(m_pad, 1))

    out2d = pl.pallas_call(
        kernel,
        out_shape=jax.ShapeDtypeStruct((m_pad, H), out_dtype),
        grid_spec=pltpu.PrefetchScalarGridSpec(
            num_scalar_prefetch=0,
            grid=(m_pad // tm_eff,),
            in_specs=in_specs,
            out_specs=pl.BlockSpec((tm_eff, H), lambda i: (i, 0)),
        ),
        compiler_params=pltpu.CompilerParams(
            dimension_semantics=("parallel",),
            vmem_limit_bytes=32 * 1024 * 1024,
        ),
    )(*inputs)

    embeddings = out2d[:M].reshape(B, S, H)
    position_embeddings = position_embeddings.reshape(B, S, E)
    return {"embeddings": embeddings, "position_embeddings": position_embeddings}


# -------------------------- pure-JAX reference ------------------------------
def _reference(input_ids, word_table, position_table, token_type_table,
               embed_proj_weight_t, gamma, beta, eps,
               token_type_ids=None, position_ids=None, mask=None,
               position_biased_input=True):
    B, S = input_ids.shape
    if position_ids is None:
        position_ids = jnp.broadcast_to(jnp.arange(S)[None, :], (B, S))
    if token_type_ids is None:
        token_type_ids = jnp.zeros_like(input_ids)
    emb = word_table[input_ids]
    pos = position_table[position_ids]
    if token_type_table is not None:
        emb = emb + token_type_table[token_type_ids]
    if position_biased_input:
        emb = emb + pos
    if embed_proj_weight_t is not None:
        emb = emb @ embed_proj_weight_t
    mean = emb.mean(-1, keepdims=True)
    var = ((emb - mean) ** 2).mean(-1, keepdims=True)
    y = (emb - mean) * lax.rsqrt(var + eps) * gamma + beta
    if mask is not None:
        y = y * mask[..., None].astype(y.dtype)
    return {"embeddings": y, "position_embeddings": pos}


if __name__ == "__main__":
    key = jax.random.PRNGKey(0)
    ks = jax.random.split(key, 12)

    B, S = 2, 8
    vocab, max_pos, type_vocab = 48, 16, 2
    E = 32
    eps = 1e-7

    word = jax.random.normal(ks[0], (vocab, E), jnp.float32) * 0.02
    word = word.at[0].set(0.0)  # padding_idx=0 row zeroed (as at nn.Embedding init)
    pos = jax.random.normal(ks[1], (max_pos, E), jnp.float32) * 0.02
    tok = jax.random.normal(ks[2], (type_vocab, E), jnp.float32) * 0.02
    input_ids = jax.random.randint(ks[3], (B, S), 0, vocab, dtype=jnp.int32)
    token_type_ids = jax.random.randint(ks[4], (B, S), 0, type_vocab, dtype=jnp.int32)

    # --- Config A: embedding_size == hidden_size (no embed_proj), no mask ---
    H_a = E
    gamma_a = 1.0 + 0.1 * jax.random.normal(ks[5], (H_a,), jnp.float32)
    beta_a = 0.1 * jax.random.normal(ks[6], (H_a,), jnp.float32)

    out_a = bert_embeddings(
        input_ids, word, pos, token_type_table=tok, embed_proj_weight_t=None,
        ln_gamma=gamma_a, ln_beta=beta_a, ln_eps=eps,
        token_type_ids=token_type_ids)
    jax.block_until_ready(out_a["embeddings"])
    ref_a = _reference(input_ids, word, pos, tok, None, gamma_a, beta_a, eps,
                       token_type_ids=token_type_ids)
    assert out_a["embeddings"].shape == (B, S, H_a)
    assert jnp.allclose(out_a["embeddings"], ref_a["embeddings"],
                        atol=1e-5, rtol=1e-5), "config A mismatch"
    assert jnp.allclose(out_a["position_embeddings"], ref_a["position_embeddings"],
                        atol=1e-6, rtol=1e-6), "config A pos mismatch"

    # --- Config B: embedding_size != hidden_size (embed_proj) + mask --------
    H_b = 128
    gamma_b = 1.0 + 0.1 * jax.random.normal(ks[7], (H_b,), jnp.float32)
    beta_b = 0.1 * jax.random.normal(ks[8], (H_b,), jnp.float32)
    proj_w = jax.random.normal(ks[9], (H_b, E), jnp.float32) * 0.02  # PyTorch [out, in]
    proj_w_t = proj_w.T  # pre-transpose ONCE (lives with the model params)
    seq_mask = (jax.random.uniform(ks[10], (B, S)) > 0.2).astype(jnp.float32)

    out_b = bert_embeddings(
        input_ids, word, pos, token_type_table=tok, embed_proj_weight_t=proj_w_t,
        ln_gamma=gamma_b, ln_beta=beta_b, ln_eps=eps,
        token_type_ids=token_type_ids, mask=seq_mask)
    jax.block_until_ready(out_b["embeddings"])
    ref_b = _reference(input_ids, word, pos, tok, proj_w_t, gamma_b, beta_b, eps,
                       token_type_ids=token_type_ids, mask=seq_mask)
    assert out_b["embeddings"].shape == (B, S, H_b)
    # Deliberately looser tolerance: the f32 MXU matmul is decomposed into
    # bf16 passes and may differ from the XLA reference dot; production use
    # is bf16 end-to-end anyway.
    assert jnp.allclose(out_b["embeddings"], ref_b["embeddings"],
                        atol=1e-2, rtol=1e-2), "config B mismatch"
    assert jnp.allclose(out_b["position_embeddings"], ref_b["position_embeddings"],
                        atol=1e-6, rtol=1e-6), "config B pos mismatch"

    print("KERNEL_OK")
</pallas_src>

<mosaic_0001>
module attributes {stable_mosaic.version = 11 : i64} {
  func.func @kernel(%arg0: i32, %arg1: memref<16x32xf32, #tpu.memory_space<vmem>>, %arg2: memref<1x32xf32, #tpu.memory_space<vmem>>, %arg3: memref<1x32xf32, #tpu.memory_space<vmem>>, %arg4: memref<16x32xf32, #tpu.memory_space<vmem>>) attributes {dimension_semantics = [#tpu.dimension_semantics<parallel>], iteration_bounds = array<i64: 1>, scalar_prefetch = 0 : i64, scratch_operands = 0 : i64, tpu.core_type = #tpu.core_type<tc>, window_params = [{transform_indices = @transform_0, window_bounds = array<i64: 16, 32>}, {pipeline_mode = #tpu.pipeline_mode<synchronous>, transform_indices = @transform_1, window_bounds = array<i64: 1, 32>}, {pipeline_mode = #tpu.pipeline_mode<synchronous>, transform_indices = @transform_2, window_bounds = array<i64: 1, 32>}, {transform_indices = @transform_3, window_bounds = array<i64: 16, 32>}]} {
    %c0 = arith.constant 0 : index
    %c0_0 = arith.constant 0 : index
    %0 = vector.load %arg1[%c0, %c0_0] : memref<16x32xf32, #tpu.memory_space<vmem>>, vector<16x32xf32>
    %cst = arith.constant dense<0.000000e+00> : vector<16xf32>
    %1 = vector.multi_reduction <add>, %0, %cst [1] : vector<16x32xf32> to vector<16xf32>
    %2 = vector.shape_cast %1 : vector<16xf32> to vector<16x1xf32>
    %cst_1 = arith.constant 3.125000e-02 : f32
    %3 = vector.broadcast %cst_1 : f32 to vector<16x1xf32>
    %4 = arith.mulf %2, %3 : vector<16x1xf32>
    %5 = arith.mulf %0, %0 : vector<16x32xf32>
    %cst_2 = arith.constant dense<0.000000e+00> : vector<16xf32>
    %6 = vector.multi_reduction <add>, %5, %cst_2 [1] : vector<16x32xf32> to vector<16xf32>
    %7 = vector.shape_cast %6 : vector<16xf32> to vector<16x1xf32>
    %cst_3 = arith.constant 3.125000e-02 : f32
    %8 = vector.broadcast %cst_3 : f32 to vector<16x1xf32>
    %9 = arith.mulf %7, %8 : vector<16x1xf32>
    %10 = arith.mulf %4, %4 : vector<16x1xf32>
    %11 = arith.subf %9, %10 : vector<16x1xf32>
    %12 = vector.broadcast %4 : vector<16x1xf32> to vector<16x32xf32>
    %13 = arith.subf %0, %12 : vector<16x32xf32>
    %cst_4 = arith.constant 1.000000e-07 : f32
    %14 = vector.broadcast %cst_4 : f32 to vector<16x1xf32>
    %15 = arith.addf %11, %14 : vector<16x1xf32>
    %16 = math.rsqrt %15 : vector<16x1xf32>
    %17 = vector.broadcast %16 : vector<16x1xf32> to vector<16x32xf32>
    %18 = arith.mulf %13, %17 : vector<16x32xf32>
    %c0_5 = arith.constant 0 : index
    %c0_6 = arith.constant 0 : index
    %19 = vector.load %arg2[%c0_5, %c0_6] : memref<1x32xf32, #tpu.memory_space<vmem>>, vector<1x32xf32>
    %20 = vector.broadcast %19 : vector<1x32xf32> to vector<16x32xf32>
    %21 = arith.mulf %18, %20 : vector<16x32xf32>
    %c0_7 = arith.constant 0 : index
    %c0_8 = arith.constant 0 : index
    %22 = vector.load %arg3[%c0_7, %c0_8] : memref<1x32xf32, #tpu.memory_space<vmem>>, vector<1x32xf32>
    %23 = vector.broadcast %22 : vector<1x32xf32> to vector<16x32xf32>
    %24 = arith.addf %21, %23 : vector<16x32xf32>
    %c0_9 = arith.constant 0 : index
    %c0_10 = arith.constant 0 : index
    %25 = vector.load %arg4[%c0_9, %c0_10] : memref<16x32xf32, #tpu.memory_space<vmem>>, vector<16x32xf32>
    tpu.vector_store %arg4[%c0_9, %c0_10], %24 {strides = array<i32>} : memref<16x32xf32, #tpu.memory_space<vmem>>, vector<16x32xf32>,
    return
  }
  func.func @transform_0(%arg0: i32) -> (i32, i32) {
    %c0_i32 = arith.constant 0 : i32
    %c0_i32_0 = arith.constant 0 : i32
    return %arg0, %c0_i32 : i32, i32
  }
  func.func @transform_1(%arg0: i32) -> (i32, i32) {
    %c0_i32 = arith.constant 0 : i32
    %c0_i32_0 = arith.constant 0 : i32
    %c0_i32_1 = arith.constant 0 : i32
    return %c0_i32, %c0_i32_0 : i32, i32
  }
  func.func @transform_2(%arg0: i32) -> (i32, i32) {
    %c0_i32 = arith.constant 0 : i32
    %c0_i32_0 = arith.constant 0 : i32
    %c0_i32_1 = arith.constant 0 : i32
    return %c0_i32, %c0_i32_0 : i32, i32
  }
  func.func @transform_3(%arg0: i32) -> (i32, i32) {
    %c0_i32 = arith.constant 0 : i32
    %c0_i32_0 = arith.constant 0 : i32
    return %arg0, %c0_i32 : i32, i32
  }
}

</mosaic_0001>

<bundles_post_ra>
// kernel: tpu_custom_call.1
= control target key start
LH: loop header
LB: loop body
LE: loop exit
PB: predicated region body
PF: predicated region fallthrough
CT: control target
= control target key end

     0   :  { %8 = vsyncpa [#allocation3], 0  ;;  %s268_s0 = inlined_call_operand.hbm [shape: f32[16,32], index: 0, kind: input, shape index: {}]   ;;  %s269_s1 = inlined_call_operand.hbm [shape: f32[1,32], index: 1, kind: input, shape index: {}]   ;;  %s270_s2 = inlined_call_operand.vmem [shape: f32[1,32], index: 2, kind: input, shape index: {}]   ;;  %s271_s3 = inlined_call_operand.hbm [shape: f32[16,32], index: 3, kind: output, shape index: {}]  }
   0x1   :  { %9 = vsyncpa [#allocation6], 0 }
   0x2   :  { %10 = vsyncpa [#allocation4], 0  ;;  %s15_s14 = sshll.u32 %s268_s0, 4  ;;  %s219_s15 = smov [#allocation2]   ;;  %s16_s14 = int_to_ptr.hbm [resolvable:$true] %s15_s14 }
   0x3   :  { %s17_s16 = sshll.u32 %s219_s15, 4  ;;  %s29_s19 = sshll.u32 %s269_s1, 4  ;;  %s18_s16 = int_to_ptr.vmem [resolvable:$true] %s17_s16  ;;  %s30_s19 = int_to_ptr.hbm [resolvable:$true] %s29_s19 }
   0x4   :  { %s220_s20 = smov 128   ;;  %s221_s21 = smov 8  }
   0x5   :  { %23 = dma.hbm_to_vmem [thread:$0]  %s16_s14, 256, %s18_s16, [#allocation3], %s220_s20, %s220_s20, %s221_s21  }
   0x6   :  { %s222_s22 = smov [#allocation5]  }
   0x7   :  { %s31_s23 = sshll.u32 %s222_s22, 4  ;;  %s32_s23 = int_to_ptr.vmem [resolvable:$true] %s31_s23 }
   0x8   :  { %34 = dma.hbm_to_vmem [thread:$0]  %s30_s19, 16, %s32_s23, [#allocation6]  }
   0x9   :  { %213 = dma.done.wait [#allocation3], 256  }
   0xa   :  { %214 = vsyncadd [#allocation3], 4294967040 }
   0xb   :  { %215 = dma.done.wait [#allocation6], 16  }
   0xc   :  { %216 = vsyncadd [#allocation6], 4294967280  ;;  %vm47_vm0 = vcmask 261120   ;;  %v45_v0 = vld [vmem:[#allocation2] sm:$0xff]  ;;  %v46_v3 = vld [vmem:[#allocation2 + $0x8] sm:$0xff]  ;;  %s223_s24 = smov [#allocation7]  }
   0xd   :  { %v48_v1 = vsel %vm47_vm0, %v45_v0, 0.0  ;;  %v56_v2 = vmul.f32 %v45_v0, %v45_v0  ;;  %v57_v5 = vmul.f32 %v46_v3, %v46_v3  ;;  %v51_v6 = vsel %vm47_vm0, %v46_v3, 0.0  ;;  %v135_v31 = vld [vmem:[#allocation5] ss:$0 sm:$0xff]  ;;  %v136_v35 = vld [vmem:[%s270_s2] ss:$0 sm:$0xff] }
   0xe   :  { %49 = vadd.xlane.f32.xlu0 %v48_v1  ;;  %s114_s25 = sshll.u32 %s223_s24, 4  ;;  %s116_s28 = sshll.u32 %s271_s3, 4  ;;  %s115_s25 = int_to_ptr.vmem [resolvable:$true] %s114_s25  ;;  %s117_s28 = int_to_ptr.hbm [resolvable:$true] %s116_s28 }
   0xf   :  { %v58_v4 = vsel %vm47_vm0, %v56_v2, 0.0  ;;  %v61_v7 = vsel %vm47_vm0, %v57_v5, 0.0 }
  0x10   :  { %59 = vadd.xlane.f32.xlu1 %v58_v4 }
  0x16   :  { %52 = vadd.xlane.f32.xlu0 %v51_v6 }
  0x18   :  { %62 = vadd.xlane.f32.xlu1 %v61_v7 }
  0x81   :  { %v50_v8 = vpop.xlane.xlu0 %49 }
  0x82   :  { %v54_v9 = vmul.f32 0.03125, %v50_v8 }
  0x83   :  { %v60_v10 = vpop.xlane.xlu1 %59 }
  0x84   :  { %v66_v11 = vmul.f32 %v54_v9, %v54_v9  ;;  %v64_v12 = vmul.f32 0.03125, %v60_v10  ;;  %v70_v30 = vsub.f32 %v45_v0, %v54_v9 }
  0x86   :  { %v68_v13 = vsub.f32 %v64_v12, %v66_v11 }
  0x88   :  { %v72_v14 = vadd.f32 1e-07, %v68_v13 }
  0x89   :  { %v53_v15 = vpop.xlane.xlu0 %52 }
  0x8a   :  { %137 = vrsqrt.f32 %v72_v14  ;;  %v55_v16 = vmul.f32 0.03125, %v53_v15  ;;  %vm80_vm2 = vweird.f32 %v72_v14 }
  0x8b   :  { %v63_v17 = vpop.xlane.xlu1 %62 }
  0x8c   :  { %v67_v18 = vmul.f32 %v55_v16, %v55_v16  ;;  %v65_v19 = vmul.f32 0.03125, %v63_v17  ;;  %v71_v41 = vsub.f32 %v46_v3, %v55_v16 }
  0x8e   :  { %v69_v20 = vsub.f32 %v65_v19, %v67_v18 }
  0x90   :  { %v138_v21 = vpop.eup %137  ;;  %v73_v22 = vadd.f32 1e-07, %v69_v20 }
  0x91   :  { %v75_v23 = vmul.f32 %v138_v21, %v72_v14  ;;  %vm81_vm1 = vweird.f32 %v138_v21 }
  0x92   :  { %139 = vrsqrt.f32 %v73_v22  ;;  %vm82_vm3 = vmor %vm80_vm2, %vm81_vm1  ;;  %vm90_vm5 = vweird.f32 %v73_v22 }
  0x93   :  { %v76_v24 = vmul.f32 %v138_v21, %v75_v23 }
  0x95   :  { %v77_v25 = vmul.f32 0.5, %v76_v24 }
  0x97   :  { %v78_v26 = vsub.f32 1.5, %v77_v25 }
  0x98   :  { %v140_v27 = vpop.eup %139 }
  0x99   :  { %v79_v28 = vmul.f32 %v138_v21, %v78_v26  ;;  %v85_v29 = vmul.f32 %v140_v27, %v73_v22  ;;  %vm91_vm4 = vweird.f32 %v140_v27 }
  0x9a   :  { %vm92_vm6 = vmor %vm90_vm5, %vm91_vm4 }
  0x9b   :  { %v83_v32 = vsel %vm82_vm3, %v138_v21, %v79_v28  ;;  %v86_v33 = vmul.f32 %v140_v27, %v85_v29 }
  0x9c   :  { %v94_v34 = vmul.f32 %v83_v32, %v70_v30 }
  0x9d   :  { %v87_v36 = vmul.f32 0.5, %v86_v33 }
  0x9e   :  { %v100_v37 = vmul.f32 %v135_v31, %v94_v34 }
  0x9f   :  { %v88_v38 = vsub.f32 1.5, %v87_v36 }
  0xa0   :  { %v106_v39 = vadd.f32 %v136_v35, %v100_v37 }
  0xa1   :  { %v89_v40 = vmul.f32 %v140_v27, %v88_v38 }
  0xa2   :  { %108 = vst.msk [vmem:[#allocation7] sm:$0xff] %vm47_vm0, %v106_v39 }
  0xa3   :  { %v93_v42 = vsel %vm92_vm6, %v140_v27, %v89_v40 }
  0xa4   :  { %v95_v43 = vmul.f32 %v93_v42, %v71_v41 }
  0xa6   :  { %v101_v44 = vmul.f32 %v135_v31, %v95_v43 }
  0xa8   :  { %v107_v45 = vadd.f32 %v136_v35, %v101_v44 }
  0xaa   :  { %109 = vst.msk [vmem:[#allocation7 + $0x8] sm:$0xff] %vm47_vm0, %v107_v45 }
  0xab   :  { %122 = dma.vmem_to_hbm [thread:$0]  %s115_s25, 256, %s117_s28, [#allocation4], %s220_s20, %s220_s20, %s221_s21  }
  0xac   :  { %217 = dma.done.wait [#allocation4], 256  }
  0xad   :  { %218 = vsyncadd [#allocation4], 4294967040 }
  0xae   :  { %127 = vsyncpa [#allocation3], 1 }
  0xaf   :  { %128 = vsyncpa [#allocation6], 1 }
  0xb0   :  { %129 = vsyncpa [#allocation4], 1 }

</bundles_post_ra>
